<compile_context>
chip_gen: v7x
topology: tpu7x:2x2x1
jax: 0.10.0
libtpu: 0.0.40
codegen_flags: <defaults>
</compile_context>

<pallas_src>
import functools

import jax
import jax.numpy as jnp
from jax import lax
from jax.experimental import pallas as pl
from jax.experimental.pallas import tpu as pltpu


# ----------------------------------------------------------------------------
# small helpers
# ----------------------------------------------------------------------------
def _cdiv(a, b):
    return (a + b - 1) // b


def _round_up(x, m):
    return _cdiv(x, m) * m


def _pad2d(x, rows, cols):
    r, c = x.shape
    if r == rows and c == cols:
        return x
    return jnp.pad(x, ((0, rows - r), (0, cols - c)))


def _vmem_capacity_bytes():
    """Physical VMEM per TensorCore for the current chip generation."""
    try:
        info = pltpu.get_tpu_info()
        cap = getattr(info, "vmem_capacity_bytes", None)
        if cap:
            return int(cap)
    except Exception:
        pass
    return 64 * 1024 * 1024  # conservative fallback (v7x per-TC VMEM)


# ----------------------------------------------------------------------------
# forward(): pure pass-through, exactly like the PyTorch module
# ----------------------------------------------------------------------------
def text_similarity_head_forward(query_vectors, passage_vectors):
    """TextSimilarityHead.forward(): packs embeddings into a tuple, no compute."""
    return (query_vectors, passage_vectors)


# ----------------------------------------------------------------------------
# kernels
# ----------------------------------------------------------------------------
def _resident_kernel(has_pad, *refs):
    """All passages resident: scores = q @ p^T (f32 acc), then row log-softmax.

    refs = (q_ref[(tq, dp)], p_ref[(n2p, dp)], [bias_ref[(1, n2p)]], out_ref[(tq, n2p)])
    """
    if has_pad:
        q_ref, p_ref, bias_ref, out_ref = refs
    else:
        q_ref, p_ref, out_ref = refs
    s = lax.dot_general(
        q_ref[...], p_ref[...],
        dimension_numbers=(((1,), (1,)), ((), ())),   # contract last dims (q·pᵀ)
        preferred_element_type=jnp.float32)
    if has_pad:
        s = s + bias_ref[...]                          # -1e30 on padded columns
    m = jnp.max(s, axis=-1, keepdims=True)
    e = jnp.exp(s - m)
    denom = jnp.sum(e, axis=-1, keepdims=True)
    out_ref[...] = (s - m - jnp.log(denom)).astype(out_ref.dtype)


def _tiled_kernel(has_pad, tn2, *refs):
    """Passage-tiled online-softmax variant (flash-style).

    refs = (q_ref[(tq, dp)], p_ref[(tn2, dp)], [bias_ref[(1, tn2)]],
            out_ref[(tq, n2p)], m_sc[(tq,1)], l_sc[(tq,1)])
    The out block is resident across the passage ("arbitrary") axis: raw scores
    are stashed per step, and (m + log l) is subtracted on the last step.
    """
    if has_pad:
        q_ref, p_ref, bias_ref, out_ref, m_sc, l_sc = refs
    else:
        q_ref, p_ref, out_ref, m_sc, l_sc = refs

    j = pl.program_id(1)

    @pl.when(j == 0)
    def _():
        m_sc[...] = jnp.full(m_sc.shape, -jnp.inf, m_sc.dtype)
        l_sc[...] = jnp.zeros(l_sc.shape, l_sc.dtype)

    s = lax.dot_general(
        q_ref[...], p_ref[...],
        dimension_numbers=(((1,), (1,)), ((), ())),
        preferred_element_type=jnp.float32)
    if has_pad:
        s = s + bias_ref[...]

    # stash raw (masked) scores into the resident output row
    col0 = pl.multiple_of(j * tn2, tn2)
    out_ref[:, pl.ds(col0, tn2)] = s.astype(out_ref.dtype)

    # online softmax statistics
    m_prev = m_sc[...]
    m_new = jnp.maximum(m_prev, jnp.max(s, axis=-1, keepdims=True))
    l_sc[...] = (l_sc[...] * jnp.exp(m_prev - m_new)
                 + jnp.sum(jnp.exp(s - m_new), axis=-1, keepdims=True))
    m_sc[...] = m_new

    @pl.when(j == pl.num_programs(1) - 1)
    def _():
        corr = m_sc[...] + jnp.log(l_sc[...])          # (tq, 1)
        out_ref[...] = (out_ref[...].astype(jnp.float32) - corr).astype(out_ref.dtype)


# ----------------------------------------------------------------------------
# wrapper: TextSimilarityHead._embeddings_to_scores
# ----------------------------------------------------------------------------
@functools.partial(
    jax.jit,
    static_argnames=("similarity_function", "tq_max", "compute_dtype",
                     "out_dtype", "unpad", "force_tiled", "tn2"))
def embeddings_to_scores(
    query_vectors,
    passage_vectors,
    *,
    similarity_function="dot_product",
    tq_max=256,
    compute_dtype=jnp.bfloat16,
    out_dtype=jnp.float32,     # bf16 halves output HBM traffic if the loss tolerates it
    unpad=True,                # set False to keep the padded (n1p, n2p) slab (no re-copy)
    force_tiled=False,         # force the passage-tiled online-softmax path (testing)
    tn2=512,                   # passage tile width for the tiled path (multiple of 128)
):
    """[n1, D] x [n2, D] -> log-softmax similarity scores [n1, n2]."""
    n1, d = query_vectors.shape
    n2, d2 = passage_vectors.shape
    if d != d2:
        raise ValueError("query / passage embedding dims must match")

    q = query_vectors.astype(jnp.float32)
    p = passage_vectors.astype(jnp.float32)
    if "cosine" in similarity_function:
        eps = 1e-8
        q = q / jnp.maximum(jnp.linalg.norm(q, axis=-1, keepdims=True), eps)
        p = p / jnp.maximum(jnp.linalg.norm(p, axis=-1, keepdims=True), eps)

    cbytes = jnp.dtype(compute_dtype).itemsize
    obytes = jnp.dtype(out_dtype).itemsize

    # ---- padded geometry ----------------------------------------------------
    dp = _round_up(d, 128)                     # lane-dense q loads, full MXU contraction

    n1p8 = _round_up(max(n1, 1), 8)
    if n1p8 <= tq_max:
        # >= 2 query tiles when possible so the "parallel" axis spans both v7x TCs
        tq = n1p8 if n1p8 < 16 else _round_up(_cdiv(n1p8, 2), 8)
    else:
        tq = tq_max

    # ---- VMEM budget from the actual chip generation ------------------------
    vmem_cap = _vmem_capacity_bytes()
    budget = int(0.80 * vmem_cap)

    def resident_bytes(tq_, n2p_):
        v = 2 * tq_ * dp * cbytes              # query tile, double-buffered
        v += n2p_ * dp * cbytes                # passages, resident & single-buffered
        v += 2 * tq_ * n2p_ * obytes           # output tile, double-buffered
        if n2p_ != n2:
            v += n2p_ * 4                      # additive mask row, single-buffered
        return v

    def tiled_bytes(tq_, tn2_, n2p_):
        v = 2 * tq_ * dp * cbytes              # query tile
        v += 2 * tn2_ * dp * cbytes            # passage tile stream
        v += 2 * tq_ * n2p_ * obytes           # full-row output block
        v += 2 * tn2_ * 4                      # mask tile
        v += 2 * 2 * tq_ * 4                   # m / l scratch
        return v

    n2p_res = _round_up(n2, 128)
    use_tiled = force_tiled or resident_bytes(tq, n2p_res) > budget

    if not use_tiled:
        n2p = n2p_res
        vmem_needed = resident_bytes(tq, n2p)
    else:
        tn2 = min(_round_up(tn2, 128), _round_up(n2, 128))
        n2p = _round_up(n2, tn2)
        # shrink query tile until the resident full-row output block fits
        while tq > 8 and tiled_bytes(tq, tn2, n2p) > budget:
            tq = _round_up(tq // 2, 8)
        vmem_needed = tiled_bytes(tq, tn2, n2p)

    n1p = _round_up(n1p8, tq)
    has_pad = n2p != n2

    # ---- pad + cast inputs (no-op when already aligned) ----------------------
    q_pad = _pad2d(q, n1p, dp).astype(compute_dtype)
    p_pad = _pad2d(p, n2p, dp).astype(compute_dtype)
    if has_pad:
        bias = jnp.where(jnp.arange(n2p) < n2, 0.0, -1e30).astype(jnp.float32)[None, :]

    vmem_limit = int(min(max(int(vmem_needed * 1.25) + (2 << 20), 32 * 1024 * 1024),
                         int(0.85 * vmem_cap)))
    cost = pl.CostEstimate(
        flops=2 * n1p * n2p * dp,
        transcendentals=n1p * n2p,
        bytes_accessed=(n1p * dp + n2p * dp) * cbytes + n1p * n2p * obytes,
    )

    # ---- launch --------------------------------------------------------------
    if not use_tiled:
        in_specs = [
            pl.BlockSpec((tq, dp), lambda i: (i, 0)),
            # grid-invariant passages: single-buffered (never re-fetched)
            pl.BlockSpec((n2p, dp), lambda i: (0, 0), pipeline_mode=pl.Buffered(1)),
        ]
        args = [q_pad, p_pad]
        if has_pad:
            in_specs.append(
                pl.BlockSpec((1, n2p), lambda i: (0, 0), pipeline_mode=pl.Buffered(1)))
            args.append(bias)
        out = pl.pallas_call(
            functools.partial(_resident_kernel, has_pad),
            out_shape=jax.ShapeDtypeStruct((n1p, n2p), out_dtype),
            grid_spec=pltpu.PrefetchScalarGridSpec(
                num_scalar_prefetch=0,
                grid=(n1p // tq,),
                in_specs=in_specs,
                out_specs=pl.BlockSpec((tq, n2p), lambda i: (i, 0)),
            ),
            compiler_params=pltpu.CompilerParams(
                dimension_semantics=("parallel",),
                vmem_limit_bytes=vmem_limit,
            ),
            cost_estimate=cost,
        )(*args)
    else:
        in_specs = [
            pl.BlockSpec((tq, dp), lambda i, j: (i, 0)),
            pl.BlockSpec((tn2, dp), lambda i, j: (j, 0)),
        ]
        args = [q_pad, p_pad]
        if has_pad:
            in_specs.append(pl.BlockSpec((1, tn2), lambda i, j: (0, j)))
            args.append(bias)
        out = pl.pallas_call(
            functools.partial(_tiled_kernel, has_pad, tn2),
            out_shape=jax.ShapeDtypeStruct((n1p, n2p), out_dtype),
            grid_spec=pltpu.PrefetchScalarGridSpec(
                num_scalar_prefetch=0,
                grid=(n1p // tq, n2p // tn2),
                in_specs=in_specs,
                out_specs=pl.BlockSpec((tq, n2p), lambda i, j: (i, 0)),
                scratch_shapes=[pltpu.VMEM((tq, 1), jnp.float32),
                                pltpu.VMEM((tq, 1), jnp.float32)],
            ),
            compiler_params=pltpu.CompilerParams(
                dimension_semantics=("parallel", "arbitrary"),
                vmem_limit_bytes=vmem_limit,
            ),
            cost_estimate=cost,
        )(*args)

    if unpad and (n1p != n1 or n2p != n2):
        out = out[:n1, :n2]
    return out


# ----------------------------------------------------------------------------
# pure-JAX reference mirroring the kernel's precision choices
# ----------------------------------------------------------------------------
def reference_scores(query_vectors, passage_vectors, *,
                     similarity_function="dot_product", compute_dtype=jnp.bfloat16):
    q = query_vectors.astype(jnp.float32)
    p = passage_vectors.astype(jnp.float32)
    if "cosine" in similarity_function:
        eps = 1e-8
        q = q / jnp.maximum(jnp.linalg.norm(q, axis=-1, keepdims=True), eps)
        p = p / jnp.maximum(jnp.linalg.norm(p, axis=-1, keepdims=True), eps)
    scores = jnp.dot(q.astype(compute_dtype), p.astype(compute_dtype).T,
                     preferred_element_type=jnp.float32)
    return jax.nn.log_softmax(scores, axis=1)


# ----------------------------------------------------------------------------
# demo / self-test
# ----------------------------------------------------------------------------
if __name__ == "__main__":
    key = jax.random.PRNGKey(0)
    kq, kp, kq2, kp2 = jax.random.split(key, 4)

    # Case 1: small DPR-like batch (resident-passage path): 8 queries, 24 passages, dim 64.
    n_queries, n_passages, dim = 8, 24, 64
    q = jax.random.normal(kq, (n_queries, dim), jnp.float32)
    p = jax.random.normal(kp, (n_passages, dim), jnp.float32)

    # forward() semantics: pure pass-through tuple
    fq, fp = text_similarity_head_forward(q, p)
    assert fq is q and fp is p

    for sim in ("dot_product", "cosine"):
        out = embeddings_to_scores(q, p, similarity_function=sim)
        jax.block_until_ready(out)
        ref = reference_scores(q, p, similarity_function=sim)
        assert out.shape == (n_queries, n_passages)
        assert jnp.allclose(out, ref, atol=5e-3, rtol=5e-3), f"resident mismatch ({sim})"

    # Case 2: exercise the passage-tiled online-softmax path + multiple query tiles.
    n_q2, n_p2, dim2 = 16, 300, 96
    q2 = jax.random.normal(kq2, (n_q2, dim2), jnp.float32)
    p2 = jax.random.normal(kp2, (n_p2, dim2), jnp.float32)
    out2 = embeddings_to_scores(q2, p2, force_tiled=True, tn2=128)
    jax.block_until_ready(out2)
    ref2 = reference_scores(q2, p2)
    assert out2.shape == (n_q2, n_p2)
    assert jnp.allclose(out2, ref2, atol=5e-3, rtol=5e-3), "tiled mismatch"

    print("KERNEL_OK")
</pallas_src>

<mosaic_0001>
module attributes {stable_mosaic.version = 11 : i64} {
  func.func @_resident_kernel(%arg0: i32, %arg1: memref<8x128xbf16, #tpu.memory_space<vmem>>, %arg2: memref<128x128xbf16, #tpu.memory_space<vmem>>, %arg3: memref<1x128xf32, #tpu.memory_space<vmem>>, %arg4: memref<8x128xf32, #tpu.memory_space<vmem>>) attributes {dimension_semantics = [#tpu.dimension_semantics<parallel>], iteration_bounds = array<i64: 1>, scalar_prefetch = 0 : i64, scratch_operands = 0 : i64, tpu.core_type = #tpu.core_type<tc>, window_params = [{transform_indices = @transform_0, window_bounds = array<i64: 8, 128>}, {pipeline_mode = #tpu.pipeline_mode<synchronous>, transform_indices = @transform_1, window_bounds = array<i64: 128, 128>}, {pipeline_mode = #tpu.pipeline_mode<synchronous>, transform_indices = @transform_2, window_bounds = array<i64: 1, 128>}, {transform_indices = @transform_3, window_bounds = array<i64: 8, 128>}]} {
    %c0 = arith.constant 0 : index
    %c0_0 = arith.constant 0 : index
    %0 = vector.load %arg1[%c0, %c0_0] : memref<8x128xbf16, #tpu.memory_space<vmem>>, vector<8x128xbf16>
    %c0_1 = arith.constant 0 : index
    %c0_2 = arith.constant 0 : index
    %1 = vector.load %arg2[%c0_1, %c0_2] : memref<128x128xbf16, #tpu.memory_space<vmem>>, vector<128x128xbf16>
    %cst = arith.constant dense<0.000000e+00> : vector<8x128xf32>
    %2 = tpu.matmul %0, %1, %cst {dimension_numbers = #tpu.dot_dimension_numbers<[1], [1], [0], [0], [0, 0, 1, 0], [], []>} : vector<8x128xbf16>, vector<128x128xbf16>, vector<8x128xf32> -> vector<8x128xf32>
    %c0_3 = arith.constant 0 : index
    %c0_4 = arith.constant 0 : index
    %3 = vector.load %arg3[%c0_3, %c0_4] : memref<1x128xf32, #tpu.memory_space<vmem>>, vector<1x128xf32>
    %4 = vector.broadcast %3 : vector<1x128xf32> to vector<8x128xf32>
    %5 = arith.addf %2, %4 : vector<8x128xf32>
    %cst_5 = arith.constant dense<0xFF800000> : vector<8xf32>
    %6 = vector.multi_reduction <maximumf>, %5, %cst_5 [1] : vector<8x128xf32> to vector<8xf32>
    %7 = vector.shape_cast %6 : vector<8xf32> to vector<8x1xf32>
    %8 = vector.broadcast %7 : vector<8x1xf32> to vector<8x128xf32>
    %9 = arith.subf %5, %8 : vector<8x128xf32>
    %10 = math.exp %9 : vector<8x128xf32>
    %cst_6 = arith.constant dense<0.000000e+00> : vector<8xf32>
    %11 = vector.multi_reduction <add>, %10, %cst_6 [1] : vector<8x128xf32> to vector<8xf32>
    %12 = vector.shape_cast %11 : vector<8xf32> to vector<8x1xf32>
    %13 = vector.broadcast %7 : vector<8x1xf32> to vector<8x128xf32>
    %14 = arith.subf %5, %13 : vector<8x128xf32>
    %15 = math.log %12 : vector<8x1xf32>
    %16 = vector.broadcast %15 : vector<8x1xf32> to vector<8x128xf32>
    %17 = arith.subf %14, %16 : vector<8x128xf32>
    %c0_7 = arith.constant 0 : index
    %c0_8 = arith.constant 0 : index
    %18 = vector.load %arg4[%c0_7, %c0_8] : memref<8x128xf32, #tpu.memory_space<vmem>>, vector<8x128xf32>
    tpu.vector_store %arg4[%c0_7, %c0_8], %17 {strides = array<i32>} : memref<8x128xf32, #tpu.memory_space<vmem>>, vector<8x128xf32>,
    return
  }
  func.func @transform_0(%arg0: i32) -> (i32, i32) {
    %c0_i32 = arith.constant 0 : i32
    %c0_i32_0 = arith.constant 0 : i32
    return %arg0, %c0_i32 : i32, i32
  }
  func.func @transform_1(%arg0: i32) -> (i32, i32) {
    %c0_i32 = arith.constant 0 : i32
    %c0_i32_0 = arith.constant 0 : i32
    %c0_i32_1 = arith.constant 0 : i32
    return %c0_i32, %c0_i32_0 : i32, i32
  }
  func.func @transform_2(%arg0: i32) -> (i32, i32) {
    %c0_i32 = arith.constant 0 : i32
    %c0_i32_0 = arith.constant 0 : i32
    %c0_i32_1 = arith.constant 0 : i32
    return %c0_i32, %c0_i32_0 : i32, i32
  }
  func.func @transform_3(%arg0: i32) -> (i32, i32) {
    %c0_i32 = arith.constant 0 : i32
    %c0_i32_0 = arith.constant 0 : i32
    return %arg0, %c0_i32 : i32, i32
  }
}

</mosaic_0001>

<bundles_post_ra>
// kernel: embeddings_to_scores.1
= control target key start
LH: loop header
LB: loop body
LE: loop exit
PB: predicated region body
PF: predicated region fallthrough
CT: control target
= control target key end

     0   :  { %v230_v1 = vmov 0.0   ;;  %vm231_vm0 = vmmov 0   ;;  %s295_s0 = inlined_call_operand.vmem [shape: bf16[8,128], index: 0, kind: input, shape index: {}]   ;;  %s296_s1 = inlined_call_operand.vmem [shape: bf16[128,128], index: 1, kind: input, shape index: {}]   ;;  %s297_s2 = inlined_call_operand.vmem [shape: f32[1,128], index: 2, kind: input, shape index: {}]   ;;  %s298_s3 = inlined_call_operand.hbm [shape: f32[8,128], index: 3, kind: output, shape index: {}]  }
   0x1   :  { %v194_v0 = vld [vmem:[%s296_s1] sm:$0xff]   ;;  %171 = vmatprep.subr.bf16.mxu0 %v230_v1  ;;  %187 = vmatprep.mubr.msk.bf16.mxu0 %vm231_vm0, %v230_v1  ;;  %v195_v2 = vld [vmem:[%s296_s1 + $0x8] sm:$0xff]  }
   0x2   :  { %172 = vmatpush3.bf16.xpose.msra.mxu0 %v194_v0 }
   0x3   :  { %173 = vmatprep.subr.bf16.mxu0 %v230_v1 }
   0x4   :  { %8 = vsyncpa [#allocation3], 0  ;;  %v196_v3 = vld [vmem:[%s296_s1 + $0x10] sm:$0xff]   ;;  %v197_v4 = vld [vmem:[%s296_s1 + $0x18] sm:$0xff]  }
   0x5   :  { %v198_v5 = vld [vmem:[%s296_s1 + $0x20] sm:$0xff]   ;;  %v199_v6 = vld [vmem:[%s296_s1 + $0x28] sm:$0xff]   ;;  %v200_v7 = vld [vmem:[%s296_s1 + $0x30] sm:$0xff]  }
   0x6   :  { %v201_v8 = vld [vmem:[%s296_s1 + $0x38] sm:$0xff]   ;;  %v16_v9 = vld [vmem:[%s295_s0] sm:$0xf]  ;;  %s232_s0 = smov [#allocation2]  }
   0x7   :  { %v153_v10 = vld [vmem:[%s297_s2] ss:$0 sm:$0xff]  ;;  %s145_s1 = sshll.u32 %s232_s0, 4  ;;  %s146_s1 = int_to_ptr.vmem [resolvable:$true] %s145_s1 }
   0x8   :  { %s206_s2 = scalar_lea.vmem %s146_s1, 128  ;;  %p211_p1 = scmp.lt.s32.totalorder %s146_s1, %s146_s1 }
   0x9   :  { %p207_p0 = scmp.ne.s32.totalorder %s146_s1, %s206_s2  ;;  %p212_p2 = scmp.lt.s32.totalorder %s206_s2, %s206_s2 }
   0xa   :  { %174 = vmatpush3.bf16.xpose.msra.mxu0 %v195_v2 }
   0xb   :  { %175 = vmatprep.subr.bf16.mxu0 %v230_v1  ;;  %p213_p3 = por %p212_p2, %p211_p1 }
   0xd   :  { %p214_p4 = pnand %p213_p3, %p207_p0 }
  0x12   :  { %176 = vmatpush3.bf16.xpose.msra.mxu0 %v196_v3 }
  0x13   :  { %177 = vmatprep.subr.bf16.mxu0 %v230_v1 }
  0x1a   :  { %178 = vmatpush3.bf16.xpose.msra.mxu0 %v197_v4 }
  0x1b   :  { %179 = vmatprep.subr.bf16.mxu0 %v230_v1 }
  0x22   :  { %180 = vmatpush3.bf16.xpose.msra.mxu0 %v198_v5 }
  0x23   :  { %181 = vmatprep.subr.bf16.mxu0 %v230_v1 }
  0x2a   :  { %182 = vmatpush3.bf16.xpose.msra.mxu0 %v199_v6 }
  0x2b   :  { %183 = vmatprep.subr.bf16.mxu0 %v230_v1 }
  0x32   :  { %184 = vmatpush3.bf16.xpose.msra.mxu0 %v200_v7 }
  0x33   :  { %185 = vmatprep.subr.bf16.mxu0 %v230_v1 }
  0x3a   :  { %186 = vmatpush3.bf16.xpose.msra.mxu0 %v201_v8 }
  0x41   :  { %188 = vmatmul.mubr.bf16.vlgmr.msra.gmra.mrb[0].mxu0 %v16_v9 }
 0x114   :  { %v122_v11 = vpop.f32.mrb[0].mxu0 }
 0x115   :  { %v123_v12 = vadd.f32 %v153_v10, %v122_v11  ;;  %v189_v13 = vpop.f32.mrb[1].mxu0 }
 0x116   :  { %v125_v14 = vpop.f32.mrb[2].mxu0 }
 0x117   :  { %128 = vmax.xlane.f32.xlu0 %v123_v12  ;;  %v190_v15 = vpop.f32.mrb[3].mxu0 }
 0x1a4   :  { %v129_v16 = vpop.xlane.xlu0 %128 }
 0x1a5   :  { %v130_v17 = vsub.f32 %v123_v12, %v129_v16 }
 0x1a7   :  { %v131_v18 = vmul.f32 1.442695, %v130_v17 }
 0x1a9   :  { %202 = vpow2.f32 %v131_v18 }
 0x1b3   :  { %v203_v19 = vpop.eup %202 }
 0x1b4   :  { %133 = vadd.xlane.f32.xlu0 %v203_v19 }
 0x241   :  { %v134_v20 = vpop.xlane.xlu0 %133 }
 0x242   :  { %204 = vlog2.f32 %v134_v20 }
 0x24c   :  { %v205_v21 = vpop.eup %204 }
 0x24d   :  { %v136_v22 = vmul.f32 0.6931472, %v205_v21 }
 0x24f   :  { %v137_v23 = vsub.f32 %v130_v17, %v136_v22 }
 0x251   :  { %138 = vst [vmem:[#allocation2] sm:$0xff] %v137_v23 }
 0x252   :  { %217 = shalt.err (!%p214_p4)
}
 0x253   :  { %s218_s7 = scalar_lea.hbm %s298_s3, 128 }
 0x254   :  { %p219_p5 = scmp.ne.s32.totalorder %s298_s3, %s218_s7  ;;  %p222_p6 = scmp.lt.u32.totalorder %s218_s7, %s298_s3 }
 0x256   :  { %p224_p7 = pnand %p222_p6, %p219_p5 }
 0x258   :  { %227 = shalt.err (!%p224_p7)
}
 0x259   :  { %148 = dma.vmem_to_hbm [thread:$0]  %s146_s1, 128, %s298_s3, [#allocation3]  }
 0x25a   :  { %228 = dma.done.wait [#allocation3], 128  }
 0x25b   :  { %229 = vsyncadd [#allocation3], 4294967168 }
 0x25c   :  { %152 = vsyncpa [#allocation3], 1 }

</bundles_post_ra>
